<compile_context>
chip_gen: v7x
topology: tpu7x:2x2x1
jax: 0.10.0
libtpu: 0.0.40
codegen_flags: <defaults>
</compile_context>

<pallas_src>
import functools

import jax
import jax.numpy as jnp
from jax.experimental import pallas as pl
from jax.experimental.pallas import tpu as pltpu


def _fused_affine_kernel(x_ref, w_ref, b_ref, o_ref):
    """o[F_out, TN] = W_fused[F_out, F_in] @ x[F_in, TN] + b_fused[F_out].

    x_ref: VMEM (F_in, TN) tile (any float dtype).
    w_ref: SMEM (F_out, F_in) f32 -- 8 scalars.
    b_ref: SMEM (F_out,)      f32 -- 4 scalars.
    o_ref: VMEM (F_out, TN) tile.

    K = F_in = 2 is tiny, so the contraction is done as scalar x vector FMAs on the VPU
    (MXU would run a 2-deep pass at <2% utilization). Accumulation is f32 regardless of
    the I/O dtype.
    """
    f_in = x_ref.shape[0]
    f_out = o_ref.shape[0]

    # Load the F_in input rows once; upcast to f32 for accumulation.
    x_rows = [x_ref[k:k + 1, :].astype(jnp.float32) for k in range(f_in)]  # (1, TN) each

    rows = []
    for j in range(f_out):                       # static unroll, F_out = 4
        r = w_ref[j, 0] * x_rows[0]              # SMEM scalar splat * vector
        for k in range(1, f_in):                 # F_in = 2
            r = r + w_ref[j, k] * x_rows[k]
        rows.append(r + b_ref[j])

    o_ref[...] = jnp.concatenate(rows, axis=0).astype(o_ref.dtype)


def fuse_params(w1, b1, w2, b2):
    """Exact fusion of the two bias-only-separated linears (hoist this out of hot loops).

    y = (x @ w1.T + b1) @ w2.T + b2 = x @ (w2 @ w1).T + (w2 @ b1 + b2)
    """
    w_fused = (w2 @ w1).astype(jnp.float32)          # [F_out, F_in]
    b_fused = (w2 @ b1 + b2).astype(jnp.float32)     # [F_out]
    return w_fused, b_fused


def _lane_tile_and_vmem_budget(n, lane_tile=None):
    """Pick a lane tile (multiple of 128) and a VMEM budget for this generation."""
    try:
        vmem_cap = int(pltpu.get_tpu_info().vmem_capacity_bytes)
    except Exception:  # interpret mode / older runtimes: assume the smallest (v7x) VMEM
        vmem_cap = 64 << 20
    budget = min(vmem_cap // 2, 64 << 20)            # v5e/v6e -> 64 MiB, v7x -> 32 MiB

    if lane_tile is None:
        # Double-buffered, sublane-padded (->8) in + out f32 tiles cost ~128 B per lane
        # column; keep 2x headroom inside the scoped budget.
        target = (budget // 2) // 128                # v7x -> 128K lanes, v5e/v6e -> 256K
        target = max(128, (target // 128) * 128)
        n_up = pl.cdiv(n, 128) * 128
        # Keep >= 4 grid steps when n allows it (megacore sharding + DMA overlap).
        four_steps = max(128, pl.cdiv(pl.cdiv(n, 4), 128) * 128)
        tn = min(target, n_up, four_steps)
    else:
        target = max(128, (int(lane_tile) // 128) * 128)
        n_up = pl.cdiv(n, 128) * 128
        tn = min(target, n_up)
    return tn, budget


def _forward_feature_major(x_fm, w_fused, b_fused, *, lane_tile=None):
    """Core kernel launch: x_fm [F_in, N] -> out [F_out, N] (batch on the lane axis)."""
    f_in, n = x_fm.shape
    f_out = w_fused.shape[0]
    tn, vmem_budget = _lane_tile_and_vmem_budget(n, lane_tile)
    grid = (pl.cdiv(n, tn),)                         # ragged last block: masked stores

    w_sm = w_fused.astype(jnp.float32)
    b_sm = b_fused.astype(jnp.float32).reshape(f_out)

    return pl.pallas_call(
        _fused_affine_kernel,
        out_shape=jax.ShapeDtypeStruct((f_out, n), x_fm.dtype),
        grid_spec=pl.GridSpec(
            grid=grid,
            in_specs=[
                pl.BlockSpec((f_in, tn), lambda i: (0, i)),              # x tile (VMEM)
                pl.BlockSpec(memory_space=pltpu.MemorySpace.SMEM),       # fused weight
                pl.BlockSpec(memory_space=pltpu.MemorySpace.SMEM),       # fused bias
            ],
            out_specs=pl.BlockSpec((f_out, tn), lambda i: (0, i)),
        ),
        compiler_params=pltpu.CompilerParams(
            dimension_semantics=("parallel",),   # batch tiles shard across TCs on v7x
            vmem_limit_bytes=vmem_budget,
        ),
    )(x_fm, w_sm, b_sm)


@functools.partial(jax.jit, static_argnames=("lane_tile",))
def circle_model_v0_forward_feature_major(x_fm, w_fused, b_fused, *, lane_tile=None):
    """Zero-transpose fast path: x_fm [F_in, N] -> [F_out, N]."""
    return _forward_feature_major(x_fm, w_fused, b_fused, lane_tile=lane_tile)


@functools.partial(jax.jit, static_argnames=("lane_tile",))
def circle_model_v0_forward(x, w1, b1, w2, b2, *, lane_tile=None):
    """PyTorch-layout forward: x [N, F_in] -> [N, F_out].

    The whole forward (param fusion + transposes + kernel) is one jit so XLA can fuse or
    elide the layout plumbing around the Pallas call. Output dtype follows x.dtype, so
    bf16 inputs give bf16 outputs (f32 accumulation inside the kernel).
    """
    w_fused, b_fused = fuse_params(w1, b1, w2, b2)
    out_fm = _forward_feature_major(x.T, w_fused, b_fused, lane_tile=lane_tile)
    return out_fm.T


def init_params(key, input_features=2, output_features=4, hidden_units=8):
    """Deterministic init mimicking nn.Linear default (U(-1/sqrt(fan_in), +1/sqrt(fan_in)))."""
    k1, k2, k3, k4 = jax.random.split(key, 4)
    bound1 = 1.0 / jnp.sqrt(jnp.float32(input_features))
    bound2 = 1.0 / jnp.sqrt(jnp.float32(hidden_units))
    w1 = jax.random.uniform(k1, (hidden_units, input_features), jnp.float32, -bound1, bound1)
    b1 = jax.random.uniform(k2, (hidden_units,), jnp.float32, -bound1, bound1)
    w2 = jax.random.uniform(k3, (output_features, hidden_units), jnp.float32, -bound2, bound2)
    b2 = jax.random.uniform(k4, (output_features,), jnp.float32, -bound2, bound2)
    return w1, b1, w2, b2


if __name__ == "__main__":
    key = jax.random.PRNGKey(0)
    k_x, k_p = jax.random.split(key)

    N, F_IN, HID, F_OUT = 256, 2, 8, 4
    x = jax.random.normal(k_x, (N, F_IN), jnp.float32)
    w1, b1, w2, b2 = init_params(k_p, F_IN, F_OUT, HID)

    ref = (x @ w1.T + b1) @ w2.T + b2

    # 1) PyTorch-layout path (fusion + transposes + kernel under one jit).
    out = jax.block_until_ready(circle_model_v0_forward(x, w1, b1, w2, b2))
    assert out.shape == (N, F_OUT)
    assert jnp.allclose(out, ref, atol=1e-5, rtol=1e-5)

    # 2) Feature-major fast path (no transposes), fused params hoisted once.
    w_f, b_f = fuse_params(w1, b1, w2, b2)
    out_fm = jax.block_until_ready(circle_model_v0_forward_feature_major(x.T, w_f, b_f))
    assert jnp.allclose(out_fm.T, ref, atol=1e-5, rtol=1e-5)

    # 3) bf16 I/O on a ragged batch (n % 128 != 0): exercises masked tail stores and the
    #    halved-HBM-traffic path; accumulation stays f32 inside the kernel.
    N2 = 1000
    x2 = jax.random.normal(jax.random.PRNGKey(1), (N2, F_IN), jnp.float32)
    ref2 = (x2 @ w1.T + b1) @ w2.T + b2
    out2 = jax.block_until_ready(
        circle_model_v0_forward(x2.astype(jnp.bfloat16), w1, b1, w2, b2))
    assert out2.shape == (N2, F_OUT) and out2.dtype == jnp.bfloat16
    assert jnp.allclose(out2.astype(jnp.float32), ref2, atol=5e-2, rtol=5e-2)

    print("KERNEL_OK")
</pallas_src>

<mosaic_0001>
module attributes {stable_mosaic.version = 11 : i64} {
  func.func @_fused_affine_kernel(%arg0: i32, %arg1: memref<2x128xf32, #tpu.memory_space<vmem>>, %arg2: memref<4x2xf32, #tpu.memory_space<smem>>, %arg3: memref<4xf32, #tpu.memory_space<smem>>, %arg4: memref<4x128xf32, #tpu.memory_space<vmem>>) attributes {dimension_semantics = [#tpu.dimension_semantics<parallel>], iteration_bounds = array<i64: 2>, scalar_prefetch = 0 : i64, scratch_operands = 0 : i64, tpu.core_type = #tpu.core_type<tc>, window_params = [{transform_indices = @transform_0, window_bounds = array<i64: 2, 128>}, {transform_indices = @transform_1, window_bounds = array<i64: 4, 2>}, {transform_indices = @transform_2, window_bounds = array<i64: 4>}, {transform_indices = @transform_3, window_bounds = array<i64: 4, 128>}]} {
    %c0 = arith.constant 0 : index
    %c0_0 = arith.constant 0 : index
    %0 = vector.load %arg1[%c0, %c0_0] : memref<2x128xf32, #tpu.memory_space<vmem>>, vector<1x128xf32>
    %c1 = arith.constant 1 : index
    %c0_1 = arith.constant 0 : index
    %1 = vector.load %arg1[%c1, %c0_1] : memref<2x128xf32, #tpu.memory_space<vmem>>, vector<1x128xf32>
    %c0_2 = arith.constant 0 : index
    %c0_3 = arith.constant 0 : index
    %2 = memref.load %arg2[%c0_2, %c0_3] : memref<4x2xf32, #tpu.memory_space<smem>>
    %3 = vector.broadcast %2 : f32 to vector<1x128xf32>
    %4 = arith.mulf %3, %0 : vector<1x128xf32>
    %c0_4 = arith.constant 0 : index
    %c1_5 = arith.constant 1 : index
    %5 = memref.load %arg2[%c0_4, %c1_5] : memref<4x2xf32, #tpu.memory_space<smem>>
    %6 = vector.broadcast %5 : f32 to vector<1x128xf32>
    %7 = arith.mulf %6, %1 : vector<1x128xf32>
    %8 = arith.addf %4, %7 : vector<1x128xf32>
    %c0_6 = arith.constant 0 : index
    %9 = memref.load %arg3[%c0_6] : memref<4xf32, #tpu.memory_space<smem>>
    %10 = vector.broadcast %9 : f32 to vector<1x128xf32>
    %11 = arith.addf %8, %10 : vector<1x128xf32>
    %c1_7 = arith.constant 1 : index
    %c0_8 = arith.constant 0 : index
    %12 = memref.load %arg2[%c1_7, %c0_8] : memref<4x2xf32, #tpu.memory_space<smem>>
    %13 = vector.broadcast %12 : f32 to vector<1x128xf32>
    %14 = arith.mulf %13, %0 : vector<1x128xf32>
    %c1_9 = arith.constant 1 : index
    %c1_10 = arith.constant 1 : index
    %15 = memref.load %arg2[%c1_9, %c1_10] : memref<4x2xf32, #tpu.memory_space<smem>>
    %16 = vector.broadcast %15 : f32 to vector<1x128xf32>
    %17 = arith.mulf %16, %1 : vector<1x128xf32>
    %18 = arith.addf %14, %17 : vector<1x128xf32>
    %c1_11 = arith.constant 1 : index
    %19 = memref.load %arg3[%c1_11] : memref<4xf32, #tpu.memory_space<smem>>
    %20 = vector.broadcast %19 : f32 to vector<1x128xf32>
    %21 = arith.addf %18, %20 : vector<1x128xf32>
    %c2 = arith.constant 2 : index
    %c0_12 = arith.constant 0 : index
    %22 = memref.load %arg2[%c2, %c0_12] : memref<4x2xf32, #tpu.memory_space<smem>>
    %23 = vector.broadcast %22 : f32 to vector<1x128xf32>
    %24 = arith.mulf %23, %0 : vector<1x128xf32>
    %c2_13 = arith.constant 2 : index
    %c1_14 = arith.constant 1 : index
    %25 = memref.load %arg2[%c2_13, %c1_14] : memref<4x2xf32, #tpu.memory_space<smem>>
    %26 = vector.broadcast %25 : f32 to vector<1x128xf32>
    %27 = arith.mulf %26, %1 : vector<1x128xf32>
    %28 = arith.addf %24, %27 : vector<1x128xf32>
    %c2_15 = arith.constant 2 : index
    %29 = memref.load %arg3[%c2_15] : memref<4xf32, #tpu.memory_space<smem>>
    %30 = vector.broadcast %29 : f32 to vector<1x128xf32>
    %31 = arith.addf %28, %30 : vector<1x128xf32>
    %c3 = arith.constant 3 : index
    %c0_16 = arith.constant 0 : index
    %32 = memref.load %arg2[%c3, %c0_16] : memref<4x2xf32, #tpu.memory_space<smem>>
    %33 = vector.broadcast %32 : f32 to vector<1x128xf32>
    %34 = arith.mulf %33, %0 : vector<1x128xf32>
    %c3_17 = arith.constant 3 : index
    %c1_18 = arith.constant 1 : index
    %35 = memref.load %arg2[%c3_17, %c1_18] : memref<4x2xf32, #tpu.memory_space<smem>>
    %36 = vector.broadcast %35 : f32 to vector<1x128xf32>
    %37 = arith.mulf %36, %1 : vector<1x128xf32>
    %38 = arith.addf %34, %37 : vector<1x128xf32>
    %c3_19 = arith.constant 3 : index
    %39 = memref.load %arg3[%c3_19] : memref<4xf32, #tpu.memory_space<smem>>
    %40 = vector.broadcast %39 : f32 to vector<1x128xf32>
    %41 = arith.addf %38, %40 : vector<1x128xf32>
    %42 = tpu.concatenate %11, %21, %31, %41 in 0 : vector<1x128xf32>, vector<1x128xf32>, vector<1x128xf32>, vector<1x128xf32> -> vector<4x128xf32>
    %c0_20 = arith.constant 0 : index
    %c0_21 = arith.constant 0 : index
    %43 = vector.load %arg4[%c0_20, %c0_21] : memref<4x128xf32, #tpu.memory_space<vmem>>, vector<4x128xf32>
    tpu.vector_store %arg4[%c0_20, %c0_21], %42 {strides = array<i32>} : memref<4x128xf32, #tpu.memory_space<vmem>>, vector<4x128xf32>,
    return
  }
  func.func @transform_0(%arg0: i32) -> (i32, i32) {
    %c0_i32 = arith.constant 0 : i32
    %c0_i32_0 = arith.constant 0 : i32
    return %c0_i32, %arg0 : i32, i32
  }
  func.func @transform_1(%arg0: i32) -> (i32, i32) {
    %c0_i32 = arith.constant 0 : i32
    %c0_i32_0 = arith.constant 0 : i32
    %c0_i32_1 = arith.constant 0 : i32
    return %c0_i32, %c0_i32_0 : i32, i32
  }
  func.func @transform_2(%arg0: i32) -> i32 {
    %c0_i32 = arith.constant 0 : i32
    %c0_i32_0 = arith.constant 0 : i32
    return %c0_i32 : i32
  }
  func.func @transform_3(%arg0: i32) -> (i32, i32) {
    %c0_i32 = arith.constant 0 : i32
    %c0_i32_0 = arith.constant 0 : i32
    return %c0_i32, %arg0 : i32, i32
  }
}

</mosaic_0001>

<bundles_post_ra>
// kernel: circle_model_v0_forward.1
= control target key start
LH: loop header
LB: loop body
LE: loop exit
PB: predicated region body
PF: predicated region fallthrough
CT: control target
= control target key end

     0   :  { %8 = vsyncpa [#allocation4], 0  ;;  %s706_s0 = inlined_call_operand.vmem [shape: f32[2,256], index: 0, kind: input, shape index: {}]   ;;  %s707_s1 = inlined_call_operand.vmem [shape: f32[4,2], index: 1, kind: input, shape index: {}]   ;;  %s708_s2 = inlined_call_operand.vmem [shape: f32[4], index: 2, kind: input, shape index: {}]   ;;  %s709_s3 = inlined_call_operand.hbm [shape: f32[4,256], index: 3, kind: output, shape index: {}]  }
   0x1   :  { %9 = vsyncpa [#allocation6], 0 }
   0x2   :  { %10 = vsyncpa [#allocation3], 0 }
   0x3   :  { %12 = vsyncpa [#allocation3 + $0x1], 0  ;;  %s555_s12 = smov 0   ;;  %s557_s13 = smov 0  }
   0x4   :  { %s559_s14 = smov 0   ;;  %s561_s15 = smov 0  }
   0x5 LB: > { %s576_s16 = sadd.s32 4294967295, %s530_s15   ;;  %s346_s17 = sadd.s32 4294967294, %s530_s15   ;;  %s530_s15 = sphi %s561_s15, %s727_s15   ;;  %s526_s14 = sphi %s559_s14, %s726_s14   ;;  %s522_s13 = sphi %s557_s13, %s725_s13   ;;  %s518_s12 = sphi %s555_s12, %s724_s12  }
   0x6   : > { %s580_s18 = sadd.s32 1, %s530_s15   ;;  %s93_s19 = sadd.s32 1, %s526_s14 }
   0x7   : > { %s90_s20 = ssub.s32 %s530_s15, %s580_s18  ;;  %p103_p0 = scmp.ne.s32.totalorder %s526_s14, %s522_s13 }
   0x8   : > { %p91_p1 = scmp.eq.s32.totalorder %s90_s20, 0  ;;  %p104_p2 = scmp.eq.s32.totalorder %s576_s16, 1 }
   0x9   : > { %p109_p3 = scmp.ne.s32.totalorder %s522_s13, %s518_s12  ;;  %p110_p4 = scmp.eq.s32.totalorder %s346_s17, 1 }
   0xa   : > { %s591_s21 = scalar_select %p91_p1, %s526_s14, %s93_s19  }
   0xb   : > { %p593_p5 = por %p104_p2, %p103_p0  ;;  %p597_p6 = por %p110_p4, %p109_p3 }
   0xc   : > { %p347_p7 = scmp.ge.s32.totalorder %s530_s15, 1  ;;  %p117_p8 = scmp.lt.s32.totalorder %s530_s15, 3 }
   0xd   : > { %s713_s22 = scalar_select %p593_p5, 1, 0 }
   0xe   : > { %s714_s23 = scalar_select %p597_p6, 1, 0 }
   0xf   : > { %p710_p9 = scmp.eq.s32.totalorder %s576_s16, 0  ;;  %p604_p10 = pnand %p347_p7, %p117_p8 }
  0x10   : > { %s130_s27 = sshll.u32 %s707_s1, 4  ;;  %s141_s30 = sshll.u32 %s708_s2, 4  ;;  %s131_s27 = int_to_ptr.vmem [resolvable:$true] %s130_s27  ;;  %s142_s30 = int_to_ptr.vmem [resolvable:$true] %s141_s30 }
  0x11   : > { %s715_s24 = scalar_select %p604_p10, 1, 0 }
  0x12   : > { %p380_p11 = pneg %p604_p10  ;;  %s430_s5 = scalar_lea.vmem %s131_s27, 64 }
  0x13   : > { %p431_p13 = scmp.ne.s32.totalorder %s131_s27, %s430_s5  ;;  %p438_p3 = scmp.lt.s32.totalorder %s131_s27, %s131_s27 }
  0x14   : > { %p618_p12 = pnand %p710_p9, %p380_p11  ;;  %p439_p4 = scmp.lt.s32.totalorder %s430_s5, %s430_s5 }
  0x16   : > { %p432_p0 = pneg %p618_p12  ;;  %p440_p7 = por %p439_p4, %p438_p3 }
  0x18   : > { %p433_p1 = pnand %p432_p0, %p431_p13 }
  0x1a   : > { %p434_p2 = pneg %p433_p1 }
  0x1c   : > { %p441_p8 = pnand %p440_p7, %p434_p2 }
  0x1e   : > { %444 = shalt.err (!%p441_p8)
}
  0x1f   : > { %s532_s6 = smov [#allocation2]   ;;  %s445_s7 = scalar_lea.vmem %s142_s30, 16 }
  0x20   : > { %383 = dma.vmem_to_smem (!%p618_p12), %s131_s27, 64, %s532_s6, [#allocation4]  }
  0x21   : > { %p446_p11 = scmp.ne.s32.totalorder %s142_s30, %s445_s7  ;;  %p453_p5 = scmp.lt.s32.totalorder %s142_s30, %s142_s30 }
  0x22   : > { %p454_p10 = scmp.lt.s32.totalorder %s445_s7, %s445_s7 }
  0x23   : > { %p448_p9 = pnand %p446_p11, %p432_p0 }
  0x24   : > { %p455_p13 = por %p454_p10, %p453_p5 }
  0x25   : > { %p449_p6 = pneg %p448_p9 }
  0x27   : > { %p456_p1 = pnand %p455_p13, %p449_p6 }
  0x29   : > { %459 = shalt.err (!%p456_p1)
}
  0x2a   : > { %s533_s8 = smov [#allocation5]   ;;  %p717_p2 = scmp.ne.s32.totalorder %s715_s24, 0 }
  0x2b   : > { %386 = dma.vmem_to_smem (!%p618_p12), %s142_s30, 16, %s533_s8, [#allocation6]  }
  0x2c   : > { %161 = sbr.rel (%p717_p2) target bundleno = 95 (0x5f), region = 32  ;;  %p718_p3 = scmp.eq.s32.totalorder (!%p717_p2), %s576_s16, 0 }
  0x33   : > { %505 = dma.done.wait (%p718_p3), [#allocation4], 64   ;;  %p719_p4 = pmov %p718_p3 }
  0x34   : > { %p720_p9 = pmov %p718_p3 }
  0x35   : > { %507 = vsyncadd (%p719_p4), [#allocation4], 4294967232 }
  0x36   : > { %509 = dma.done.wait (%p720_p9), [#allocation6], 16   ;;  %p721_p5 = pmov %p718_p3 }
  0x38   : > { %511 = vsyncadd (%p721_p5), [#allocation6], 4294967280 }
  0x39   : > { %171 = sfence }
  0x3a   : > { %p189_p6 = scmp.lt.s32.totalorder %s576_s16, 1  ;;  %s195_s9 = sld [smem:[#allocation2]]  ;;  %vm244_vm0 = vcmask 1040384   ;;  %vm246_vm1 = vcmask 1041408   ;;  %vm248_vm2 = vcmask 1042432  }
  0x3b   : > { %s356_s10 = sld [smem:[#allocation2 + $0x1]]  ;;  %s640_s17 = sld [smem:[#allocation5]] }
  0x3c   : > { %s190_s11 = scalar_select %p189_p6, %s576_s16, 1 }
  0x3d   : > { %s357_s19 = sld [smem:[#allocation2 + $0x80]]  ;;  %s358_s24 = sld [smem:[#allocation2 + $0x81]] }
  0x3e   : > { %s355_s20 = sshll.u32 %s190_s11, 1  ;;  %s645_s28 = sld [smem:[#allocation5 + $0x1]] }
  0x3f   : > { %s192_s27 = scalar_lea.vmem %s706_s0, %s355_s20  ;;  %s360_s29 = sld [smem:[#allocation2 + $0x100]] }
  0x40   : > { %v193_v0 = vld [vmem:[%s192_s27] sm:$0x1]  ;;  %v196_v1 = vstv %s195_s9  ;;  %v194_v2 = vld [vmem:[%s192_s27 + $0x1] sm:$0x1]  ;;  %s361_s30 = sld [smem:[#allocation2 + $0x101]]  ;;  %s647_s4 = sld [smem:[#allocation5 + $0x2]] }
  0x41   : > { %v197_v3 = vmul.f32 %v196_v1, %v193_v0  ;;  %v199_v4 = vstv %s356_s10  ;;  %s363_s5 = sld [smem:[#allocation2 + $0x180]]  ;;  %s364_s6 = sld [smem:[#allocation2 + $0x181]]  ;;  %v203_v10 = vstv %s640_s17 }
  0x42   : > { %v200_v5 = vmul.f32 %v199_v4, %v194_v2  ;;  %s365_s7 = sld [smem:[#allocation5 + $0x3]]  ;;  %s186_s8 = sand.u32 1, %s522_s13  }
  0x43   : > { %v206_v6 = vstv %s357_s19  ;;  %v209_v9 = vstv %s358_s24  ;;  %s654_s9 = sshll.u32 %s186_s8, 2  ;;  %s367_s17 = sshll.u32 %s576_s16, 6 }
  0x44   : > { %v201_v7 = vadd.f32 %v200_v5, %v197_v3  ;;  %v207_v8 = vmul.f32 %v206_v6, %v193_v0  ;;  %v210_v11 = vmul.f32 %v209_v9, %v194_v2  ;;  %v213_v12 = vstv %s645_s28  ;;  %s188_s10 = scalar_lea.vmem [#allocation7], %s654_s9  ;;  %s664_s24 = scalar_lea.hbm %s709_s3, %s367_s17 }
  0x45   : > { %v216_v13 = vstv %s360_s29  ;;  %s265_s11 = sshll.u32 %s188_s10, 4  ;;  %s252_s25 = scalar_lea.sflag [#allocation3], %s186_s8  ;;  %s659_s11 = int_to_ptr.vmem [resolvable:$true] %s265_s11 }
  0x46   : > { %v211_v14 = vadd.f32 %v210_v11, %v207_v8  ;;  %v217_v15 = vmul.f32 %v216_v13, %v193_v0  ;;  %v219_v16 = vstv %s361_s30  ;;  %v204_v17 = vadd.f32 %v203_v10, %v201_v7  ;;  %s460_s26 = scalar_lea.vmem %s659_s11, 64  ;;  %p722_p12 = scmp.ne.s32.totalorder %s713_s22, 0 }
  0x47   : > { %v220_v18 = vmul.f32 %v219_v16, %v194_v2  ;;  %v226_v19 = vstv %s363_s5  ;;  %v229_v20 = vstv %s364_s6  ;;  %v223_v22 = vstv %s647_s4  ;;  %p461_p10 = scmp.ne.s32.totalorder %s659_s11, %s460_s26  ;;  %s534_s16 = smov [#allocation7]  }
  0x48   : > { %v214_v21 = vadd.f32 %v213_v12, %v211_v14  ;;  %v227_v23 = vmul.f32 %v226_v19, %v193_v0  ;;  %v230_v24 = vmul.f32 %v229_v20, %v194_v2  ;;  %v233_v26 = vstv %s365_s7  ;;  %s464_s27 = sshll.u32 %s534_s16, 4  ;;  %s465_s27 = int_to_ptr.vmem [resolvable:$false] %s464_s27 }
  0x49   : > { %v221_v25 = vadd.f32 %v220_v18, %v217_v15  ;;  %p462_p0 = pnand %p461_p10, %p722_p12  ;;  %s466_s28 = scalar_lea.vmem %s465_s27, 128 }
  0x4a   : > { %v231_v27 = vadd.f32 %v230_v24, %v227_v23  ;;  %v236_v28 = vrot.slane %v214_v21, 7  ;;  %p467_p8 = scmp.lt.s32.totalorder %s659_s11, %s465_s27  ;;  %p468_p11 = scmp.lt.s32.totalorder %s466_s28, %s460_s26 }
  0x4b   : > { %v224_v29 = vadd.f32 %v223_v22, %v221_v25  ;;  %p463_p7 = pneg %p462_p0 }
  0x4c   : > { %v234_v30 = vadd.f32 %v233_v26, %v231_v27  ;;  %v245_v31 = vsel %vm244_vm0, %v204_v17, %v236_v28  ;;  %p469_p13 = por %p468_p11, %p467_p8 }
  0x4d   : > { %v239_v32 = vrot.slane %v224_v29, 6 }
  0x4e   : > { %v242_v33 = vrot.slane %v234_v30, 5  ;;  %p470_p1 = pnand %p469_p13, %p463_p7 }
  0x4f   : > { %v247_v34 = vsel %vm246_vm1, %v245_v31, %v239_v32 }
  0x50   : > { %v249_v35 = vsel %vm248_vm2, %v247_v34, %v242_v33 }
  0x51   : > { %250 = vst [vmem:[%s188_s10] sm:$0xf] %v249_v35 }
  0x52   : > { %473 = shalt.err (!%p470_p1)
}
  0x53   : > { %s474_s29 = scalar_lea.hbm %s664_s24, 64  ;;  %s478_s5 = scalar_lea.hbm %s709_s3, 128 }
  0x54   : > { %p475_p2 = scmp.ne.s32.totalorder %s664_s24, %s474_s29  ;;  %p479_p9 = scmp.lt.u32.totalorder %s664_s24, %s709_s3 }
  0x55   : > { %p480_p5 = scmp.lt.u32.totalorder %s478_s5, %s474_s29  ;;  %p482_p10 = scmp.lt.u32.totalorder %s474_s29, %s664_s24 }
  0x56   : > { %p476_p3 = pnand %p475_p2, %p722_p12 }
  0x57   : > { %p481_p6 = por %p480_p5, %p479_p9 }
  0x58   : > { %p477_p4 = pneg %p476_p3 }
  0x59   : > { %p483_p0 = por %p482_p10, %p481_p6 }
  0x5b   : > { %p484_p7 = pnand %p483_p0, %p477_p4 }
  0x5d   : > { %487 = shalt.err (!%p484_p7)
}
  0x5e   : > { %378 = dma.vmem_to_hbm [thread:$0]  (%p722_p12), %s659_s11, 64, %s664_s24, %s252_s25  }
  0x5f PF: > { %p395_p8 = scmp.ge.s32.totalorder %s530_s15, 2  ;;  %s277_s8 = sand.u32 1, %s518_s12  }
  0x60   : > { %p723_p11 = scmp.ne.s32.totalorder %s714_s23, 0  ;;  %s278_s9 = scalar_lea.sflag [#allocation3], %s277_s8 }
  0x62   : > { %p388_p13 = pnand %p395_p8, %p723_p11 }
  0x64   : > { %513 = dma.done.wait (!%p388_p13), %s278_s9, 64  }
  0x65   : > { %515 = vsyncadd (!%p388_p13), %s278_s9, 4294967232  ;;  %p15_p1 = scmp.ge.s32.totalorder %s580_s18, 4   ;;  %s724_s12 = smov %s522_s13 }
  0x66   : > { %s725_s13 = smov %s526_s14  ;;  %s726_s14 = smov %s591_s21 }
  0x67   : > { %s727_s15 = smov %s580_s18  ;;  %17 = sbr.rel (!%p15_p1) target bundleno = 5 (0x5), region = 76 }
  0x6e   :  { %283 = vsyncpa [#allocation3], 1 }
  0x6f   :  { %285 = vsyncpa [#allocation3 + $0x1], 1 }
  0x70   :  { %286 = vsyncpa [#allocation4], 1 }
  0x71   :  { %288 = vsyncpa [#allocation4 + $0x1], 1 }
  0x72   :  { %289 = vsyncpa [#allocation6], 1 }

</bundles_post_ra>
